<compile_context>
chip_gen: v5e
topology: v5e:2x2
jax: 0.10.0
libtpu: 0.0.40
codegen_flags: <defaults>
</compile_context>

<pallas_src>
import functools
import math

import jax
import jax.numpy as jnp
from jax.experimental import pallas as pl
from jax.experimental.pallas import tpu as pltpu


# ----------------------------- tiled linear kernel -------------------------- #

def _linear_kernel(x_ref, w_ref, o_ref, acc_ref):
    """One (tm, tn) output tile, accumulated over the K grid axis."""
    @pl.when(pl.program_id(2) == 0)
    def _():
        acc_ref[...] = jnp.zeros_like(acc_ref)

    # bf16 operands, f32 accumulation (MXU fast path on all three generations).
    acc_ref[...] += jnp.dot(
        x_ref[...].astype(jnp.bfloat16),
        w_ref[...].astype(jnp.bfloat16),
        preferred_element_type=jnp.float32,
    )

    @pl.when(pl.program_id(2) == pl.num_programs(2) - 1)
    def _():
        o_ref[...] = acc_ref[...].astype(o_ref.dtype)


def _pick_tile(dim, target, align):
    """Largest `align`-multiple tile <= target that divides dim; else the full dim."""
    if dim <= target:
        return dim
    t = (target // align) * align
    while t >= align:
        if dim % t == 0:
            return t
        t -= align
    return dim


def pallas_linear(x, w_t, *, tm=256, tn=512, tk=512):
    """x: (B, S, Din) @ w_t: (Din, Dout) pre-transposed, no bias -> (B, S, Dout).

    Grid: (M tiles, N tiles, K tiles).  M/N are 'parallel' (megacore), K is the
    innermost 'arbitrary' reduction axis with an f32 VMEM accumulator, so
    neither the activation nor the weight has to be fully VMEM-resident at
    production sizes (v7x: 64 MiB).  Tiles clamp to full dims at toy sizes.
    """
    B, S, Din = x.shape
    Dout = w_t.shape[1]
    M = B * S
    x2 = x.reshape(M, Din)

    tm = _pick_tile(M, tm, 16)       # sublane-aligned (16 keeps bf16 packing tidy)
    tn = _pick_tile(Dout, tn, 128)   # lane-aligned
    tk = _pick_tile(Din, tk, 128)    # lane dim of x block / sublane dim of w block

    grid = (M // tm, Dout // tn, Din // tk)

    y = pl.pallas_call(
        _linear_kernel,
        out_shape=jax.ShapeDtypeStruct((M, Dout), x.dtype),
        grid_spec=pltpu.PrefetchScalarGridSpec(
            num_scalar_prefetch=0,
            grid=grid,
            in_specs=[
                pl.BlockSpec((tm, tk), lambda i, j, k: (i, k)),
                pl.BlockSpec((tk, tn), lambda i, j, k: (k, j)),
            ],
            out_specs=pl.BlockSpec((tm, tn), lambda i, j, k: (i, j)),
            scratch_shapes=[pltpu.VMEM((tm, tn), jnp.float32)],
        ),
        compiler_params=pltpu.CompilerParams(
            dimension_semantics=("parallel", "parallel", "arbitrary"),
            # TODO(synk): at production sizes set vmem_limit_bytes and sweep tm in
            # {512, 1024} on v5e/v6e while staying well under v7x's 64 MiB.
        ),
    )(x2, w_t)
    return y.reshape(B, S, Dout)


# --------------------------- fused multi-head attention --------------------- #

def _mha_attention_kernel(vlen_ref, q_ref, k_ref, v_ref, o_ref, *,
                          num_heads, head_dim):
    """One batch element of multi-head scaled dot-product attention.

    q_ref: (1, Sq, H*Dh), k_ref/v_ref: (1, Sk, H*Dh), o_ref: (1, Sq, H*Dh).
    vlen_ref: SMEM int32[(B,)] scalar-prefetch, valid key length per batch row.
    Heads are contiguous Dh-wide slices of the last dim (same layout as the
    PyTorch transpose_qkv / transpose_output pair), so head split + merge is
    fused into this kernel.  The 1/sqrt(Dh) scale is already folded into W_q.
    """
    b = pl.program_id(0)
    vlen = vlen_ref[b]

    # Cast once for the MXU; softmax math stays in f32 (v5e has no bf16 VPU/EUP).
    q = q_ref[0].astype(jnp.bfloat16)      # (Sq, H*Dh)
    k = k_ref[0].astype(jnp.bfloat16)      # (Sk, H*Dh)
    v = v_ref[0].astype(jnp.bfloat16)      # (Sk, H*Dh)
    Sq, Sk = q.shape[0], k.shape[0]

    # d2l masked_softmax: key positions >= valid_len get -1e6 before softmax.
    # Head-independent -> computed once, hoisted out of the head loop.
    col = jax.lax.broadcasted_iota(jnp.int32, (Sq, Sk), 1)
    keep = col < vlen

    # TODO(synk): replace the Dh=8 per-head loop with a batched-head contraction
    # (or a (B, H, Sq-tile) grid) once head_dim >= 128 to fill the MXU.
    for h in range(num_heads):             # static unrolled loop, H is small
        lo, hi = h * head_dim, (h + 1) * head_dim
        qh = q[:, lo:hi]                   # (Sq, Dh) bf16
        kh = k[:, lo:hi]                   # (Sk, Dh) bf16
        vh = v[:, lo:hi]                   # (Sk, Dh) bf16

        # Contract over the last dims directly (no in-kernel transpose of K).
        s = jax.lax.dot_general(
            qh, kh, (((1,), (1,)), ((), ())),
            preferred_element_type=jnp.float32)          # (Sq, Sk) f32
        s = jnp.where(keep, s, jnp.float32(-1e6))

        s = s - jnp.max(s, axis=-1, keepdims=True)
        p = jnp.exp(s)
        # approx reciprocal -> EUP slot (free); tolerance is bf16-level anyway.
        p = p * pl.reciprocal(jnp.sum(p, axis=-1, keepdims=True), approx=True)

        # TODO(synk): dropout on attention weights skipped (eval-mode identity).
        out_h = jnp.dot(p.astype(jnp.bfloat16), vh,
                        preferred_element_type=jnp.float32)   # (Sq, Dh) f32

        # Store each head straight into its lane slice: no concat, no extra
        # live f32 head results, o_ref fully covered after the loop.
        o_ref[0, :, lo:hi] = out_h.astype(o_ref.dtype)


def pallas_multihead_attention(q, k, v, valid_lens_b, num_heads):
    """q: (B, Sq, H*Dh), k/v: (B, Sk, H*Dh), valid_lens_b: int32 (B,)."""
    B, Sq, D = q.shape
    Sk = k.shape[1]
    head_dim = D // num_heads
    kernel = functools.partial(
        _mha_attention_kernel, num_heads=num_heads, head_dim=head_dim)
    return pl.pallas_call(
        kernel,
        out_shape=jax.ShapeDtypeStruct((B, Sq, D), q.dtype),
        grid_spec=pltpu.PrefetchScalarGridSpec(
            num_scalar_prefetch=1,
            grid=(B,),
            in_specs=[
                pl.BlockSpec((1, Sq, D), lambda b, vl: (b, 0, 0)),
                pl.BlockSpec((1, Sk, D), lambda b, vl: (b, 0, 0)),
                pl.BlockSpec((1, Sk, D), lambda b, vl: (b, 0, 0)),
            ],
            out_specs=pl.BlockSpec((1, Sq, D), lambda b, vl: (b, 0, 0)),
        ),
        compiler_params=pltpu.CompilerParams(
            dimension_semantics=("parallel",)   # disjoint output blocks, megacore-safe
        ),
    )(valid_lens_b, q, k, v)


# ----------------------------- module wrapper ------------------------------ #

class MultiHeadAttention:
    def __init__(self, key_size, query_size, value_size, num_hiddens, num_heads,
                 dropout=0.0, bias=False, key=None):
        assert not bias
        self.num_heads = num_heads
        head_dim = num_hiddens // num_heads
        key = jax.random.PRNGKey(42) if key is None else key
        kq, kk, kv, ko = jax.random.split(key, 4)

        def init_t(k, out_f, in_f):
            # PyTorch nn.Linear init, stored pre-transposed as (in_f, out_f).
            bound = 1.0 / math.sqrt(in_f)
            w = jax.random.uniform(k, (out_f, in_f), jnp.float32, -bound, bound)
            return jnp.transpose(w)

        # 1/sqrt(head_dim) score scale folded into W_q once at init.
        self.W_q_t = init_t(kq, num_hiddens, query_size) * (1.0 / math.sqrt(head_dim))
        self.W_k_t = init_t(kk, num_hiddens, key_size)
        self.W_v_t = init_t(kv, num_hiddens, value_size)
        self.W_o_t = init_t(ko, num_hiddens, num_hiddens)

        # Pre-concatenated weights for fused projections (launch-count reduction).
        self.W_qkv_t = (jnp.concatenate([self.W_q_t, self.W_k_t, self.W_v_t], axis=1)
                        if query_size == key_size == value_size else None)
        self.W_kv_t = (jnp.concatenate([self.W_k_t, self.W_v_t], axis=1)
                       if key_size == value_size else None)

    def __call__(self, queries, keys, values, valid_lens):
        # Projections (heads live as contiguous Dh slices of the last dim).
        if queries is keys and keys is values and self.W_qkv_t is not None:
            # Self-attention: one fused matmul against (Din, 3*num_hiddens).
            qkv = pallas_linear(queries, self.W_qkv_t)          # (B, S, 3*H*Dh)
            q, k, v = jnp.split(qkv, 3, axis=-1)
        elif keys is values and self.W_kv_t is not None:
            q = pallas_linear(queries, self.W_q_t)
            kv = pallas_linear(keys, self.W_kv_t)               # (B, Sk, 2*H*Dh)
            k, v = jnp.split(kv, 2, axis=-1)
        else:
            q = pallas_linear(queries, self.W_q_t)              # (B, Sq, H*Dh)
            k = pallas_linear(keys, self.W_k_t)                 # (B, Sk, H*Dh)
            v = pallas_linear(values, self.W_v_t)               # (B, Sk, H*Dh)

        if valid_lens is None:
            vlens_b = jnp.full((q.shape[0],), k.shape[1], dtype=jnp.int32)
        else:
            # TODO(synk): 2-D per-query valid_lens (d2l variant) not supported.
            assert valid_lens.ndim == 1
            vlens_b = valid_lens.astype(jnp.int32)

        # Head split / attention / merge fused in one kernel -> (B, Sq, H*Dh).
        ctx = pallas_multihead_attention(q, k, v, vlens_b, self.num_heads)
        return pallas_linear(ctx, self.W_o_t)


# ------------------------------ pure-JAX reference -------------------------- #

def reference_mha(mha, queries, keys, values, valid_lens):
    # Note: the 1/sqrt(head_dim) scale is folded into mha.W_q_t, so no extra
    # divide here — mathematically identical to the PyTorch module's formula.
    H = mha.num_heads
    q = queries @ mha.W_q_t
    k = keys @ mha.W_k_t
    v = values @ mha.W_v_t
    B, Sq, D = q.shape
    Sk = k.shape[1]
    Dh = D // H
    qh = q.reshape(B, Sq, H, Dh).transpose(0, 2, 1, 3)
    kh = k.reshape(B, Sk, H, Dh).transpose(0, 2, 1, 3)
    vh = v.reshape(B, Sk, H, Dh).transpose(0, 2, 1, 3)
    scores = jnp.einsum("bhqd,bhkd->bhqk", qh, kh)
    if valid_lens is not None:
        col = jnp.arange(Sk)[None, None, None, :]
        scores = jnp.where(col < valid_lens[:, None, None, None], scores, -1e6)
    p = jax.nn.softmax(scores, axis=-1)
    out = jnp.einsum("bhqk,bhkd->bhqd", p, vh)
    out = out.transpose(0, 2, 1, 3).reshape(B, Sq, D)
    return out @ mha.W_o_t


# ----------------------------------- main ----------------------------------- #

if __name__ == "__main__":
    key = jax.random.PRNGKey(0)
    kq, kk, kv = jax.random.split(key, 3)

    batch, seq_q, seq_kv = 2, 8, 8
    query_size = key_size = value_size = 16
    num_hiddens, num_heads = 32, 4

    queries = jax.random.normal(kq, (batch, seq_q, query_size), jnp.float32)
    keys = jax.random.normal(kk, (batch, seq_kv, key_size), jnp.float32)
    values = jax.random.normal(kv, (batch, seq_kv, value_size), jnp.float32)
    valid_lens = jnp.array([3, 6], dtype=jnp.int32)

    mha = MultiHeadAttention(key_size, query_size, value_size,
                             num_hiddens, num_heads, dropout=0.0, bias=False)

    # Cross-attention path (separate Q/K/V projection kernels).
    out = mha(queries, keys, values, valid_lens)
    out = jax.block_until_ready(out)
    ref = reference_mha(mha, queries, keys, values, valid_lens)
    assert out.shape == (batch, seq_q, num_hiddens)
    # bf16 MXU operands -> tolerance relaxed from 1e-4 to 2e-2.
    assert jnp.allclose(out, ref, rtol=2e-2, atol=2e-2), "cross-attn mismatch"

    # Self-attention path (fused single-launch QKV projection).
    valid_lens_self = jnp.array([2, 7], dtype=jnp.int32)
    out_self = mha(queries, queries, queries, valid_lens_self)
    out_self = jax.block_until_ready(out_self)
    ref_self = reference_mha(mha, queries, queries, queries, valid_lens_self)
    assert out_self.shape == (batch, seq_q, num_hiddens)
    assert jnp.allclose(out_self, ref_self, rtol=2e-2, atol=2e-2), "self-attn mismatch"

    print("KERNEL_OK")
</pallas_src>

<mosaic_0001>
module attributes {stable_mosaic.version = 11 : i64} {
  func.func @_linear_kernel(%arg0: i32, %arg1: i32, %arg2: i32, %arg3: memref<16x16xf32, #tpu.memory_space<vmem>>, %arg4: memref<16x32xf32, #tpu.memory_space<vmem>>, %arg5: memref<16x32xf32, #tpu.memory_space<vmem>>, %arg6: memref<16x32xf32, #tpu.memory_space<vmem>>) attributes {dimension_semantics = [#tpu.dimension_semantics<parallel>, #tpu.dimension_semantics<parallel>, #tpu.dimension_semantics<arbitrary>], iteration_bounds = array<i64: 1, 1, 1>, scalar_prefetch = 0 : i64, scratch_operands = 1 : i64, tpu.core_type = #tpu.core_type<tc>, window_params = [{transform_indices = @transform_0, window_bounds = array<i64: 16, 16>}, {transform_indices = @transform_1, window_bounds = array<i64: 16, 32>}, {transform_indices = @transform_2, window_bounds = array<i64: 16, 32>}]} {
    %c0_i32 = arith.constant 0 : i32
    %0 = arith.cmpi eq, %arg2, %c0_i32 : i32
    %1 = arith.extui %0 : i1 to i32
    %c0_i32_0 = arith.constant 0 : i32
    %2 = arith.cmpi ne, %1, %c0_i32_0 : i32
    scf.if %2 {
      %cst_10 = arith.constant 0.000000e+00 : f32
      %14 = vector.broadcast %cst_10 : f32 to vector<16x32xf32>
      %c0_11 = arith.constant 0 : index
      %c0_12 = arith.constant 0 : index
      %15 = vector.load %arg6[%c0_11, %c0_12] : memref<16x32xf32, #tpu.memory_space<vmem>>, vector<16x32xf32>
      tpu.vector_store %arg6[%c0_11, %c0_12], %14 {strides = array<i32>} : memref<16x32xf32, #tpu.memory_space<vmem>>, vector<16x32xf32>,
    } else {
    }
    %c0 = arith.constant 0 : index
    %c0_1 = arith.constant 0 : index
    %3 = vector.load %arg6[%c0, %c0_1] : memref<16x32xf32, #tpu.memory_space<vmem>>, vector<16x32xf32>
    %c0_2 = arith.constant 0 : index
    %c0_3 = arith.constant 0 : index
    %4 = vector.load %arg3[%c0_2, %c0_3] : memref<16x16xf32, #tpu.memory_space<vmem>>, vector<16x16xf32>
    %5 = arith.truncf %4 : vector<16x16xf32> to vector<16x16xbf16>
    %c0_4 = arith.constant 0 : index
    %c0_5 = arith.constant 0 : index
    %6 = vector.load %arg4[%c0_4, %c0_5] : memref<16x32xf32, #tpu.memory_space<vmem>>, vector<16x32xf32>
    %7 = arith.truncf %6 : vector<16x32xf32> to vector<16x32xbf16>
    %cst = arith.constant dense<0.000000e+00> : vector<16x32xf32>
    %8 = tpu.matmul %5, %7, %cst {dimension_numbers = #tpu.dot_dimension_numbers<[1], [0], [0], [1], [0, 0, 1, 1], [], []>} : vector<16x16xbf16>, vector<16x32xbf16>, vector<16x32xf32> -> vector<16x32xf32>
    %9 = arith.addf %3, %8 : vector<16x32xf32>
    %c0_6 = arith.constant 0 : index
    %c0_7 = arith.constant 0 : index
    %10 = vector.load %arg6[%c0_6, %c0_7] : memref<16x32xf32, #tpu.memory_space<vmem>>, vector<16x32xf32>
    tpu.vector_store %arg6[%c0_6, %c0_7], %9 {strides = array<i32>} : memref<16x32xf32, #tpu.memory_space<vmem>>, vector<16x32xf32>,
    %c0_i32_8 = arith.constant 0 : i32
    %11 = arith.cmpi eq, %arg2, %c0_i32_8 : i32
    %12 = arith.extui %11 : i1 to i32
    %c0_i32_9 = arith.constant 0 : i32
    %13 = arith.cmpi ne, %12, %c0_i32_9 : i32
    scf.if %13 {
      %c0_10 = arith.constant 0 : index
      %c0_11 = arith.constant 0 : index
      %14 = vector.load %arg6[%c0_10, %c0_11] : memref<16x32xf32, #tpu.memory_space<vmem>>, vector<16x32xf32>
      %c0_12 = arith.constant 0 : index
      %c0_13 = arith.constant 0 : index
      %15 = vector.load %arg5[%c0_12, %c0_13] : memref<16x32xf32, #tpu.memory_space<vmem>>, vector<16x32xf32>
      tpu.vector_store %arg5[%c0_12, %c0_13], %14 {strides = array<i32>} : memref<16x32xf32, #tpu.memory_space<vmem>>, vector<16x32xf32>,
    } else {
    }
    return
  }
  func.func @transform_0(%arg0: i32, %arg1: i32, %arg2: i32) -> (i32, i32) {
    %c0_i32 = arith.constant 0 : i32
    return %arg0, %arg2 : i32, i32
  }
  func.func @transform_1(%arg0: i32, %arg1: i32, %arg2: i32) -> (i32, i32) {
    %c0_i32 = arith.constant 0 : i32
    return %arg2, %arg1 : i32, i32
  }
  func.func @transform_2(%arg0: i32, %arg1: i32, %arg2: i32) -> (i32, i32) {
    %c0_i32 = arith.constant 0 : i32
    return %arg0, %arg1 : i32, i32
  }
}

</mosaic_0001>

<bundles_post_ra>
// kernel: tpu_custom_call.1
= control target key start
LH: loop header
LB: loop body
LE: loop exit
PB: predicated region body
PF: predicated region fallthrough
CT: control target
= control target key end

     0   :  { %7 = vsyncpa [#allocation4], 0  ;;  %s240_s0 = inlined_call_operand.hbm [shape: f32[16,16], index: 0, kind: input, shape index: {}]   ;;  %s241_s1 = inlined_call_operand.hbm [shape: f32[16,32], index: 1, kind: input, shape index: {}]   ;;  %s242_s2 = inlined_call_operand.hbm [shape: f32[16,32], index: 2, kind: output, shape index: {}]  }
   0x1   :  { %8 = vsyncpa [#allocation7], 0 }
   0x2   :  { %9 = vsyncpa [#allocation5], 0  ;;  %s14_s11 = sshll.u32 %s240_s0, 4  ;;  %s195_s12 = smov [#allocation3]   ;;  %s15_s11 = int_to_ptr.hbm [resolvable:$true] %s14_s11 }
   0x3   :  { %s16_s13 = sshll.u32 %s195_s12, 4  ;;  %s27_s16 = sshll.u32 %s241_s1, 4  ;;  %s17_s13 = int_to_ptr.vmem [resolvable:$true] %s16_s13  ;;  %s28_s16 = int_to_ptr.hbm [resolvable:$true] %s27_s16 }
   0x4   :  { %s196_s17 = smov 128   ;;  %s197_s18 = smov 8  }
   0x5   :  { %22 = dma.hbm_to_vmem [thread:$0]  %s15_s11, 256, %s17_s13, [#allocation4], %s196_s17, %s196_s17, %s197_s18  }
   0x6   :  { %s198_s19 = smov [#allocation6]  }
   0x7   :  { %s29_s20 = sshll.u32 %s198_s19, 4  ;;  %s30_s20 = int_to_ptr.vmem [resolvable:$true] %s29_s20 }
   0x8   :  { %35 = dma.hbm_to_vmem [thread:$0]  %s28_s16, 256, %s30_s20, [#allocation7], %s196_s17, %s196_s17, %s197_s18  }
   0x9   :  { %189 = dma.done.wait [#allocation4], 256  }
   0xa   :  { %190 = vsyncadd [#allocation4], 4294967040 }
   0xb   :  { %191 = dma.done.wait [#allocation7], 256  }
   0xc   :  { %192 = vsyncadd [#allocation7], 4294967040  ;;  %vm49_vm0 = vcmask 261120   ;;  %v199_v0 = vmov 0.0   ;;  %v57_v1 = vld [vmem:[#allocation6] sm:$0xff]  ;;  %v58_v2 = vld [vmem:[#allocation6 + $0x8] sm:$0xff] }
   0xd   :  { %50 = vst.msk [vmem:[#allocation2] sm:$0xff] %vm49_vm0, %v199_v0  ;;  %v54_v3 = vld [vmem:[#allocation3] sm:$0xff]  ;;  %v59_v4 = vpack.c.bf16 %v58_v2, %v57_v1  ;;  %v55_v5 = vld [vmem:[#allocation3 + $0x8] sm:$0xff]  ;;  %vm60_vm1 = vcmask 130048   ;;  %s200_s0 = smov [#allocation8]   ;;  %s96_s23 = sshll.u32 %s242_s2, 4  ;;  %s97_s23 = int_to_ptr.hbm [resolvable:$true] %s96_s23 }
   0xe   :  { %51 = vst.msk [vmem:[#allocation2 + $0x8] sm:$0xff] %vm49_vm0, %v199_v0  ;;  %v56_v6 = vpack.c.bf16 %v55_v5, %v54_v3  ;;  %s94_s1 = sshll.u32 %s200_s0, 4  ;;  %s95_s1 = int_to_ptr.vmem [resolvable:$true] %s94_s1 }
   0xf   :  { %71 = vmatpush.bf16.msra.mxu0 %v59_v4 }
  0x12   :  { %110 = vmatmul.msk.bf16.vlgmr.msra.gmra.mxu0 %vm60_vm1, %v56_v6 }
  0x14   :  { %v52_v7 = vld [vmem:[#allocation2] sm:$0xff] }
  0x15   :  { %v53_v10 = vld [vmem:[#allocation2 + $0x8] sm:$0xff] }
  0x8f   :  { %v73_v8 = vpop.f32.mrf.mxu0 }
  0x90   :  { %v78_v9 = vadd.f32 %v73_v8, %v52_v7 }
  0x92   :  { %81 = vst.msk [vmem:[#allocation2] sm:$0xff] %vm49_vm0, %v78_v9 }
  0x97   :  { %v75_v11 = vpop.f32.mrf.mxu0 }
  0x98   :  { %v79_v12 = vadd.f32 %v75_v11, %v53_v10 }
  0x99   :  { %v86_v13 = vld [vmem:[#allocation2] sm:$0xff] }
  0x9a   :  { %82 = vst.msk [vmem:[#allocation2 + $0x8] sm:$0xff] %vm49_vm0, %v79_v12 }
  0x9b   :  { %88 = vst.msk [vmem:[#allocation8] sm:$0xff] %vm49_vm0, %v86_v13 }
  0xa1   :  { %v87_v14 = vld [vmem:[#allocation2 + $0x8] sm:$0xff] }
  0xa2   :  { %89 = vst.msk [vmem:[#allocation8 + $0x8] sm:$0xff] %vm49_vm0, %v87_v14 }
  0xa3   :  { %102 = dma.vmem_to_hbm [thread:$0]  %s95_s1, 256, %s97_s23, [#allocation5], %s196_s17, %s196_s17, %s197_s18  }
  0xa4   :  { %193 = dma.done.wait [#allocation5], 256  }
  0xa5   :  { %194 = vsyncadd [#allocation5], 4294967040 }
  0xa6   :  { %107 = vsyncpa [#allocation4], 1 }
  0xa7   :  { %108 = vsyncpa [#allocation7], 1 }
  0xa8   :  { %109 = vsyncpa [#allocation5], 1 }

</bundles_post_ra>
